<compile_context>
chip_gen: v6e
topology: v6e:2x2x1
jax: 0.10.0
libtpu: 0.0.40
codegen_flags: <defaults>
</compile_context>

<pallas_src>
import jax
import jax.numpy as jnp
from jax.experimental import pallas as pl
from jax.experimental.pallas import tpu as pltpu


def _clip_loss_kernel(img_ref, txt_ref, scale_ref, out_ref,
                      img_scr, m_scr, l_scr, acc_ref):
    B, _ = img_ref.shape
    TN = txt_ref.shape[0]
    k = pl.program_id(0)

    # Text tile (f32 cast is a no-op for f32 inputs; used by the MXU matmul and
    # by the tile-0 diagonal term).
    txt = txt_ref[...].astype(jnp.float32)                        # [TN, D]

    @pl.when(k == 0)
    def _init():
        scale = scale_ref[0, 0]
        # Fold the logit scale into the [B, D] image operand once (much cheaper
        # than scaling every [B, TN] logits tile) and keep it resident in VMEM.
        img_scaled = img_ref[...].astype(jnp.float32) * scale      # [B, D]
        img_scr[...] = img_scaled
        m_scr[...] = jnp.full((B, 1), -jnp.inf, jnp.float32)
        l_scr[...] = jnp.zeros((B, 1), jnp.float32)
        acc_ref[0] = jnp.float32(0.0)          # running sum of text-side LSEs
        # Correct-class logits = diag(scale * img @ txt[:B].T); identical for
        # both CE terms, and only their sum is needed -> one [B, D] VPU
        # multiply + full reduce (no [B, N] mask pass).  Requires B <= TN so
        # txt rows 0..B-1 all live in tile 0 (asserted in the wrapper).
        acc_ref[1] = jnp.sum(img_scaled * txt[:B, :])

    # [B, TN] logits tile.  Contract on the last dim of both operands so the
    # MXU is fed in native layout (no XLU transpose of txt).
    scores = jax.lax.dot_general(
        img_scr[...], txt,
        dimension_numbers=(((1,), (1,)), ((), ())),
        preferred_element_type=jnp.float32)

    # ---- image-side CE: online (flash-style) LSE over the N axis -----------
    tile_max = jnp.max(scores, axis=-1, keepdims=True)             # [B, 1]
    m_new = jnp.maximum(m_scr[...], tile_max)
    alpha = jnp.exp(m_scr[...] - m_new)
    l_scr[...] = alpha * l_scr[...] + jnp.sum(jnp.exp(scores - m_new),
                                              axis=-1, keepdims=True)
    m_scr[...] = m_new

    # ---- text-side CE: text row j (< B) reduces over all B image rows, so its
    # full LSE is contained in the single tile holding column j.  Only tiles
    # overlapping the first B columns do any work here. ----------------------
    @pl.when(k * TN < B)
    def _text_side():
        col_max = jnp.max(scores, axis=0, keepdims=True)           # [1, TN]
        col_lse = jnp.log(jnp.sum(jnp.exp(scores - col_max), axis=0,
                                  keepdims=True)) + col_max        # [1, TN]
        col_id = k * TN + jax.lax.broadcasted_iota(jnp.int32, (1, TN), 1)
        acc_ref[0] = acc_ref[0] + jnp.sum(
            jnp.where(col_id < B, col_lse, 0.0))

    @pl.when(k == pl.num_programs(0) - 1)
    def _finalize():
        lse_img = m_scr[...] + jnp.log(l_scr[...])                 # [B, 1]
        total = jnp.sum(lse_img) + acc_ref[0] - 2.0 * acc_ref[1]
        out_ref[0, 0] = total / jnp.float32(2 * B)


def _default_tile_n(n, max_tile=512):
    """Pick a lane-friendly tile along N that divides N (or fall back to N)."""
    if n <= max_tile:
        return n
    for tn in (512, 384, 256, 128):
        if tn <= max_tile and n % tn == 0:
            return tn
    for tn in range(max_tile - max_tile % 8, 7, -8):
        if n % tn == 0:
            return tn
    return n


def clip_contrastive_loss(image_features, text_features, logit_scale, *,
                          tile_n=None):
    """JAX wrapper matching CustomLoss.forward semantics."""
    B, D = image_features.shape
    N, D2 = text_features.shape
    assert D == D2 and N >= B

    if tile_n is None:
        tile_n = _default_tile_n(N)
    assert N % tile_n == 0, "tile_n must divide N"
    assert tile_n == N or tile_n % 8 == 0, "tile_n must be sublane-aligned"
    # TODO(synk): support B > tile_n (per-tile diagonal extraction), native
    # bf16 MXU operands, and a 'parallel' B-chunk axis for v7x dual TC.
    assert B <= tile_n, "diagonal term assumes the first text tile covers B rows"
    num_tiles = N // tile_n

    scale = jnp.asarray(logit_scale, jnp.float32).reshape(1, 1)
    itemsize = image_features.dtype.itemsize

    out = pl.pallas_call(
        _clip_loss_kernel,
        out_shape=jax.ShapeDtypeStruct((1, 1), jnp.float32),
        grid=(num_tiles,),
        in_specs=[
            pl.BlockSpec((B, D), lambda k: (0, 0)),          # img: resident
            pl.BlockSpec((tile_n, D), lambda k: (k, 0)),     # txt: pipelined tiles
            pl.BlockSpec(memory_space=pltpu.MemorySpace.SMEM),  # scalar scale
        ],
        out_specs=pl.BlockSpec(memory_space=pltpu.MemorySpace.SMEM),  # scalar loss
        scratch_shapes=[
            pltpu.VMEM((B, D), jnp.float32),   # scaled image features (resident)
            pltpu.VMEM((B, 1), jnp.float32),   # running row max (image LSE)
            pltpu.VMEM((B, 1), jnp.float32),   # running row sum-exp (image LSE)
            pltpu.SMEM((2,), jnp.float32),     # [sum text LSE, sum diag logits]
        ],
        compiler_params=pltpu.CompilerParams(
            dimension_semantics=("arbitrary",)),
        cost_estimate=pl.CostEstimate(
            flops=2 * B * N * D + 2 * B * D,
            transcendentals=B * N + B * min(B, tile_n) * ((B + tile_n - 1) // tile_n),
            bytes_accessed=(B * D + N * D) * itemsize + 8),
    )(image_features, text_features, scale)
    return out[0, 0]


def _reference_loss(image_features, text_features, logit_scale):
    """Pure-JAX reference mirroring the PyTorch module."""
    B = image_features.shape[0]
    img = image_features.astype(jnp.float32)
    txt = text_features.astype(jnp.float32)
    hi = jax.lax.Precision.HIGHEST
    logits_i = logit_scale * jnp.einsum("bd,nd->bn", img, txt, precision=hi)
    logits_t = logit_scale * jnp.einsum("nd,bd->nb", txt[:B], img, precision=hi)
    labels = jnp.arange(B)

    def ce(logits):
        logp = jax.nn.log_softmax(logits, axis=-1)
        return -jnp.mean(logp[jnp.arange(logits.shape[0]), labels])

    return (ce(logits_i) + ce(logits_t)) / 2.0


if __name__ == "__main__":
    key = jax.random.PRNGKey(0)
    k1, k2, k3 = jax.random.split(key, 3)
    logit_scale = jnp.float32(1.0 / 0.07)   # CLIP default exp(log(1/0.07))

    B, D = 8, 128

    def _l2norm(x):
        return x / jnp.linalg.norm(x, axis=-1, keepdims=True)

    img = _l2norm(jax.random.normal(k1, (B, D), jnp.float32))

    # Case 1: classic CLIP batch (N == B), single text tile.
    txt_small = _l2norm(jax.random.normal(k2, (B, D), jnp.float32))
    loss1 = clip_contrastive_loss(img, txt_small, logit_scale)
    jax.block_until_ready(loss1)
    ref1 = _reference_loss(img, txt_small, logit_scale)
    assert jnp.allclose(loss1, ref1, rtol=1e-4, atol=1e-4), (loss1, ref1)

    # Case 2: text bank larger than batch -> multi-tile online-LSE path.
    N = 1024
    txt_big = _l2norm(jax.random.normal(k3, (N, D), jnp.float32))
    loss2 = clip_contrastive_loss(img, txt_big, logit_scale, tile_n=256)
    jax.block_until_ready(loss2)
    ref2 = _reference_loss(img, txt_big, logit_scale)
    assert jnp.allclose(loss2, ref2, rtol=1e-4, atol=1e-4), (loss2, ref2)

    print("KERNEL_OK")
</pallas_src>

<mosaic_0001>
module attributes {stable_mosaic.version = 11 : i64} {
  func.func @_clip_loss_kernel(%arg0: i32, %arg1: memref<8x128xf32, #tpu.memory_space<vmem>>, %arg2: memref<8x128xf32, #tpu.memory_space<vmem>>, %arg3: memref<1x1xf32, #tpu.memory_space<smem>>, %arg4: memref<1x1xf32, #tpu.memory_space<smem>>, %arg5: memref<8x128xf32, #tpu.memory_space<vmem>>, %arg6: memref<8x1xf32, #tpu.memory_space<vmem>>, %arg7: memref<8x1xf32, #tpu.memory_space<vmem>>, %arg8: memref<2xf32, #tpu.memory_space<smem>>) attributes {dimension_semantics = [#tpu.dimension_semantics<arbitrary>], iteration_bounds = array<i64: 1>, scalar_prefetch = 0 : i64, scratch_operands = 4 : i64, tpu.core_type = #tpu.core_type<tc>, window_params = [{pipeline_mode = #tpu.pipeline_mode<synchronous>, transform_indices = @transform_0, window_bounds = array<i64: 8, 128>}, {transform_indices = @transform_1, window_bounds = array<i64: 8, 128>}, {transform_indices = @transform_2, window_bounds = array<i64: 1, 1>}, {transform_indices = @transform_3, window_bounds = array<i64: 1, 1>}]} {
    %c0 = arith.constant 0 : index
    %c0_0 = arith.constant 0 : index
    %0 = vector.load %arg2[%c0, %c0_0] : memref<8x128xf32, #tpu.memory_space<vmem>>, vector<8x128xf32>
    %c0_i32 = arith.constant 0 : i32
    %1 = arith.cmpi eq, %arg0, %c0_i32 : i32
    %2 = arith.extui %1 : i1 to i32
    %c0_i32_1 = arith.constant 0 : i32
    %3 = arith.cmpi ne, %2, %c0_i32_1 : i32
    scf.if %3 {
      %c0_20 = arith.constant 0 : index
      %c0_21 = arith.constant 0 : index
      %30 = memref.load %arg3[%c0_20, %c0_21] : memref<1x1xf32, #tpu.memory_space<smem>>
      %c0_22 = arith.constant 0 : index
      %c0_23 = arith.constant 0 : index
      %31 = vector.load %arg1[%c0_22, %c0_23] : memref<8x128xf32, #tpu.memory_space<vmem>>, vector<8x128xf32>
      %32 = vector.broadcast %30 : f32 to vector<8x128xf32>
      %33 = arith.mulf %31, %32 : vector<8x128xf32>
      %c0_24 = arith.constant 0 : index
      %c0_25 = arith.constant 0 : index
      %34 = vector.load %arg5[%c0_24, %c0_25] : memref<8x128xf32, #tpu.memory_space<vmem>>, vector<8x128xf32>
      tpu.vector_store %arg5[%c0_24, %c0_25], %33 {strides = array<i32>} : memref<8x128xf32, #tpu.memory_space<vmem>>, vector<8x128xf32>,
      %cst_26 = arith.constant 0xFF800000 : f32
      %35 = vector.broadcast %cst_26 : f32 to vector<8x1xf32>
      %c0_27 = arith.constant 0 : index
      %c0_28 = arith.constant 0 : index
      %36 = vector.load %arg6[%c0_27, %c0_28] : memref<8x1xf32, #tpu.memory_space<vmem>>, vector<8x1xf32>
      tpu.vector_store %arg6[%c0_27, %c0_28], %35 {strides = array<i32>} : memref<8x1xf32, #tpu.memory_space<vmem>>, vector<8x1xf32>,
      %cst_29 = arith.constant 0.000000e+00 : f32
      %37 = vector.broadcast %cst_29 : f32 to vector<8x1xf32>
      %c0_30 = arith.constant 0 : index
      %c0_31 = arith.constant 0 : index
      %38 = vector.load %arg7[%c0_30, %c0_31] : memref<8x1xf32, #tpu.memory_space<vmem>>, vector<8x1xf32>
      tpu.vector_store %arg7[%c0_30, %c0_31], %37 {strides = array<i32>} : memref<8x1xf32, #tpu.memory_space<vmem>>, vector<8x1xf32>,
      %cst_32 = arith.constant 0.000000e+00 : f32
      %c0_33 = arith.constant 0 : index
      %39 = memref.load %arg8[%c0_33] : memref<2xf32, #tpu.memory_space<smem>>
      memref.store %cst_32, %arg8[%c0_33] : memref<2xf32, #tpu.memory_space<smem>>
      %40 = arith.mulf %33, %0 : vector<8x128xf32>
      %41 = vector.shape_cast %40 : vector<8x128xf32> to vector<1x8x128xf32>
      %cst_34 = arith.constant dense<0.000000e+00> : vector<1xf32>
      %42 = vector.multi_reduction <add>, %41, %cst_34 [1, 2] : vector<1x8x128xf32> to vector<1xf32>
      %43 = vector.shape_cast %42 : vector<1xf32> to vector<1x1x1xf32>
      %44 = vector.extract %43[0, 0, 0] : f32 from vector<1x1x1xf32>
      %c1 = arith.constant 1 : index
      %45 = memref.load %arg8[%c1] : memref<2xf32, #tpu.memory_space<smem>>
      memref.store %44, %arg8[%c1] : memref<2xf32, #tpu.memory_space<smem>>
    } else {
    }
    %c0_2 = arith.constant 0 : index
    %c0_3 = arith.constant 0 : index
    %4 = vector.load %arg5[%c0_2, %c0_3] : memref<8x128xf32, #tpu.memory_space<vmem>>, vector<8x128xf32>
    %cst = arith.constant dense<0.000000e+00> : vector<8x8xf32>
    %5 = tpu.matmul %4, %0, %cst {dimension_numbers = #tpu.dot_dimension_numbers<[1], [1], [0], [0], [0, 0, 1, 0], [], []>} : vector<8x128xf32>, vector<8x128xf32>, vector<8x8xf32> -> vector<8x8xf32>
    %cst_4 = arith.constant dense<0xFF800000> : vector<8xf32>
    %6 = vector.multi_reduction <maximumf>, %5, %cst_4 [1] : vector<8x8xf32> to vector<8xf32>
    %7 = vector.shape_cast %6 : vector<8xf32> to vector<8x1xf32>
    %c0_5 = arith.constant 0 : index
    %c0_6 = arith.constant 0 : index
    %8 = vector.load %arg6[%c0_5, %c0_6] : memref<8x1xf32, #tpu.memory_space<vmem>>, vector<8x1xf32>
    %9 = arith.maximumf %8, %7 : vector<8x1xf32>
    %c0_7 = arith.constant 0 : index
    %c0_8 = arith.constant 0 : index
    %10 = vector.load %arg6[%c0_7, %c0_8] : memref<8x1xf32, #tpu.memory_space<vmem>>, vector<8x1xf32>
    %11 = arith.subf %10, %9 : vector<8x1xf32>
    %12 = math.exp %11 : vector<8x1xf32>
    %c0_9 = arith.constant 0 : index
    %c0_10 = arith.constant 0 : index
    %13 = vector.load %arg7[%c0_9, %c0_10] : memref<8x1xf32, #tpu.memory_space<vmem>>, vector<8x1xf32>
    %14 = arith.mulf %12, %13 : vector<8x1xf32>
    %15 = vector.broadcast %9 : vector<8x1xf32> to vector<8x8xf32>
    %16 = arith.subf %5, %15 : vector<8x8xf32>
    %17 = math.exp %16 : vector<8x8xf32>
    %cst_11 = arith.constant dense<0.000000e+00> : vector<8xf32>
    %18 = vector.multi_reduction <add>, %17, %cst_11 [1] : vector<8x8xf32> to vector<8xf32>
    %19 = vector.shape_cast %18 : vector<8xf32> to vector<8x1xf32>
    %20 = arith.addf %14, %19 : vector<8x1xf32>
    %c0_12 = arith.constant 0 : index
    %c0_13 = arith.constant 0 : index
    %21 = vector.load %arg7[%c0_12, %c0_13] : memref<8x1xf32, #tpu.memory_space<vmem>>, vector<8x1xf32>
    tpu.vector_store %arg7[%c0_12, %c0_13], %20 {strides = array<i32>} : memref<8x1xf32, #tpu.memory_space<vmem>>, vector<8x1xf32>,
    %c0_14 = arith.constant 0 : index
    %c0_15 = arith.constant 0 : index
    %22 = vector.load %arg6[%c0_14, %c0_15] : memref<8x1xf32, #tpu.memory_space<vmem>>, vector<8x1xf32>
    tpu.vector_store %arg6[%c0_14, %c0_15], %9 {strides = array<i32>} : memref<8x1xf32, #tpu.memory_space<vmem>>, vector<8x1xf32>,
    %c8_i32 = arith.constant 8 : i32
    %23 = arith.muli %arg0, %c8_i32 : i32
    %c8_i32_16 = arith.constant 8 : i32
    %24 = arith.cmpi slt, %23, %c8_i32_16 : i32
    %25 = arith.extui %24 : i1 to i32
    %c0_i32_17 = arith.constant 0 : i32
    %26 = arith.cmpi ne, %25, %c0_i32_17 : i32
    scf.if %26 {
      %cst_20 = arith.constant dense<0xFF800000> : vector<8xf32>
      %30 = vector.multi_reduction <maximumf>, %5, %cst_20 [0] : vector<8x8xf32> to vector<8xf32>
      %31 = vector.shape_cast %30 : vector<8xf32> to vector<1x8xf32>
      %32 = vector.broadcast %31 : vector<1x8xf32> to vector<8x8xf32>
      %33 = arith.subf %5, %32 : vector<8x8xf32>
      %34 = math.exp %33 : vector<8x8xf32>
      %cst_21 = arith.constant dense<0.000000e+00> : vector<8xf32>
      %35 = vector.multi_reduction <add>, %34, %cst_21 [0] : vector<8x8xf32> to vector<8xf32>
      %36 = vector.shape_cast %35 : vector<8xf32> to vector<1x8xf32>
      %37 = math.log %36 : vector<1x8xf32>
      %38 = arith.addf %37, %31 : vector<1x8xf32>
      %c8_i32_22 = arith.constant 8 : i32
      %39 = arith.muli %arg0, %c8_i32_22 : i32
      %40 = tpu.iota {dimensions = array<i32: 1>} : vector<1x8xi32>
      %41 = vector.broadcast %39 : i32 to vector<1x8xi32>
      %42 = arith.addi %41, %40 : vector<1x8xi32>
      %c0_23 = arith.constant 0 : index
      %43 = memref.load %arg8[%c0_23] : memref<2xf32, #tpu.memory_space<smem>>
      %c8_i32_24 = arith.constant 8 : i32
      %44 = vector.broadcast %c8_i32_24 : i32 to vector<1x8xi32>
      %45 = arith.cmpi slt, %42, %44 : vector<1x8xi32>
      %cst_25 = arith.constant 0.000000e+00 : f32
      %46 = vector.broadcast %cst_25 : f32 to vector<1x8xf32>
      %47 = arith.select %45, %38, %46 : vector<1x8xi1>, vector<1x8xf32>
      %48 = vector.shape_cast %47 : vector<1x8xf32> to vector<1x1x8xf32>
      %cst_26 = arith.constant dense<0.000000e+00> : vector<1xf32>
      %49 = vector.multi_reduction <add>, %48, %cst_26 [1, 2] : vector<1x1x8xf32> to vector<1xf32>
      %50 = vector.shape_cast %49 : vector<1xf32> to vector<1x1x1xf32>
      %51 = vector.extract %50[0, 0, 0] : f32 from vector<1x1x1xf32>
      %52 = arith.addf %43, %51 : f32
      %c0_27 = arith.constant 0 : index
      %53 = memref.load %arg8[%c0_27] : memref<2xf32, #tpu.memory_space<smem>>
      memref.store %52, %arg8[%c0_27] : memref<2xf32, #tpu.memory_space<smem>>
    } else {
    }
    %c0_i32_18 = arith.constant 0 : i32
    %27 = arith.cmpi eq, %arg0, %c0_i32_18 : i32
    %28 = arith.extui %27 : i1 to i32
    %c0_i32_19 = arith.constant 0 : i32
    %29 = arith.cmpi ne, %28, %c0_i32_19 : i32
    scf.if %29 {
      %c0_20 = arith.constant 0 : index
      %c0_21 = arith.constant 0 : index
      %30 = vector.load %arg6[%c0_20, %c0_21] : memref<8x1xf32, #tpu.memory_space<vmem>>, vector<8x1xf32>
      %c0_22 = arith.constant 0 : index
      %c0_23 = arith.constant 0 : index
      %31 = vector.load %arg7[%c0_22, %c0_23] : memref<8x1xf32, #tpu.memory_space<vmem>>, vector<8x1xf32>
      %32 = math.log %31 : vector<8x1xf32>
      %33 = arith.addf %30, %32 : vector<8x1xf32>
      %34 = vector.shape_cast %33 : vector<8x1xf32> to vector<1x8x1xf32>
      %cst_24 = arith.constant dense<0.000000e+00> : vector<1xf32>
      %35 = vector.multi_reduction <add>, %34, %cst_24 [1, 2] : vector<1x8x1xf32> to vector<1xf32>
      %36 = vector.shape_cast %35 : vector<1xf32> to vector<1x1x1xf32>
      %37 = vector.extract %36[0, 0, 0] : f32 from vector<1x1x1xf32>
      %c0_25 = arith.constant 0 : index
      %38 = memref.load %arg8[%c0_25] : memref<2xf32, #tpu.memory_space<smem>>
      %39 = arith.addf %37, %38 : f32
      %c1 = arith.constant 1 : index
      %40 = memref.load %arg8[%c1] : memref<2xf32, #tpu.memory_space<smem>>
      %cst_26 = arith.constant 2.000000e+00 : f32
      %41 = arith.mulf %cst_26, %40 : f32
      %42 = arith.subf %39, %41 : f32
      %cst_27 = arith.constant 1.600000e+01 : f32
      %43 = arith.divf %42, %cst_27 : f32
      %c0_28 = arith.constant 0 : index
      %c0_29 = arith.constant 0 : index
      %44 = memref.load %arg4[%c0_28, %c0_29] : memref<1x1xf32, #tpu.memory_space<smem>>
      memref.store %43, %arg4[%c0_28, %c0_29] : memref<1x1xf32, #tpu.memory_space<smem>>
    } else {
    }
    return
  }
  func.func @transform_0(%arg0: i32) -> (i32, i32) {
    %c0_i32 = arith.constant 0 : i32
    %c0_i32_0 = arith.constant 0 : i32
    %c0_i32_1 = arith.constant 0 : i32
    return %c0_i32, %c0_i32_0 : i32, i32
  }
  func.func @transform_1(%arg0: i32) -> (i32, i32) {
    %c0_i32 = arith.constant 0 : i32
    %c0_i32_0 = arith.constant 0 : i32
    return %arg0, %c0_i32 : i32, i32
  }
  func.func @transform_2(%arg0: i32) -> (i32, i32) {
    %c0_i32 = arith.constant 0 : i32
    %c0_i32_0 = arith.constant 0 : i32
    %c0_i32_1 = arith.constant 0 : i32
    return %c0_i32, %c0_i32_0 : i32, i32
  }
  func.func @transform_3(%arg0: i32) -> (i32, i32) {
    %c0_i32 = arith.constant 0 : i32
    %c0_i32_0 = arith.constant 0 : i32
    %c0_i32_1 = arith.constant 0 : i32
    return %c0_i32, %c0_i32_0 : i32, i32
  }
}

</mosaic_0001>

<bundles_post_ra>
// kernel: tpu_custom_call.1
= control target key start
LH: loop header
LB: loop body
LE: loop exit
PB: predicated region body
PF: predicated region fallthrough
CT: control target
= control target key end

     0   :  { %9 = vsyncpa [#allocation8], 0  ;;  %s385_s0 = inlined_call_operand.hbm [shape: f32[8,128], index: 0, kind: input, shape index: {}]   ;;  %s386_s1 = inlined_call_operand.hbm [shape: f32[8,128], index: 1, kind: input, shape index: {}]   ;;  %s387_s2 = inlined_call_operand.<no memory space> [shape: f32[1,1], index: 2, kind: input, shape index: {}]   ;;  %s388_s3 = inlined_call_operand.hbm [shape: f32[1,1], index: 3, kind: output, shape index: {}]  }
   0x1   :  { %10 = vsyncpa [#allocation11], 0 }
   0x2   :  { %11 = vsyncpa [#allocation9], 0  ;;  %s338_s12 = smov [#allocation7]   ;;  %s339_s14 = smov [#allocation10]  }
   0x3   :  { %s18_s13 = sshll.u32 %s338_s12, 4  ;;  %s28_s15 = sshll.u32 %s339_s14, 4  ;;  %s19_s13 = int_to_ptr.vmem [resolvable:$true] %s18_s13  ;;  %s29_s15 = int_to_ptr.vmem [resolvable:$true] %s28_s15 }
   0x4   :  { %s292_s16 = scalar_lea.vmem %s19_s13, 128  ;;  %p297_p1 = scmp.lt.s32.totalorder %s19_s13, %s19_s13 }
   0x5   :  { %p293_p0 = scmp.ne.s32.totalorder %s19_s13, %s292_s16  ;;  %p298_p2 = scmp.lt.s32.totalorder %s292_s16, %s292_s16 }
   0x7   :  { %p299_p3 = por %p298_p2, %p297_p1 }
   0x9   :  { %p300_p4 = pnand %p299_p3, %p293_p0 }
   0xb   :  { %303 = shalt.err (!%p300_p4)
}
   0xc   :  { %21 = dma.hbm_to_vmem [thread:$0]  %s385_s0, 128, %s19_s13, [#allocation8]  }
   0xd   :  { %s312_s19 = scalar_lea.vmem %s29_s15, 128  ;;  %p317_p6 = scmp.lt.s32.totalorder %s29_s15, %s29_s15 }
   0xe   :  { %p313_p5 = scmp.ne.s32.totalorder %s29_s15, %s312_s19  ;;  %p318_p7 = scmp.lt.s32.totalorder %s312_s19, %s312_s19 }
  0x10   :  { %p319_p8 = por %p318_p7, %p317_p6 }
  0x12   :  { %p320_p9 = pnand %p319_p8, %p313_p5 }
  0x14   :  { %323 = shalt.err (!%p320_p9)
}
  0x15   :  { %31 = dma.hbm_to_vmem [thread:$0]  %s386_s1, 128, %s29_s15, [#allocation11]  }
  0x16   :  { %332 = dma.done.wait [#allocation8], 128  }
  0x17   :  { %333 = vsyncadd [#allocation8], 4294967168 }
  0x18   :  { %334 = dma.done.wait [#allocation11], 128  }
  0x19   :  { %335 = vsyncadd [#allocation11], 4294967168  ;;  %vm50_vm0 = vcmask 7168   ;;  %v340_v0 = vmov 0.0   ;;  %vm341_vm1 = vmmov 0   ;;  %v47_v1 = vstv %s387_s2  ;;  %v40_v2 = vld [vmem:[#allocation10] sm:$0xff] }
  0x1a   :  { %52 = vst.msk [vmem:[#allocation4] sm:$0xff] %vm50_vm0, %v340_v0  ;;  %255 = vmatprep.subr.mxu0 %v340_v0  ;;  %257 = vmatprep.mubr.msk.f32.mxu0 %vm341_vm1, %v340_v0  ;;  %v46_v3 = vld [vmem:[#allocation7] sm:$0xff]  ;;  %v342_v5 = vmov -inf   ;;  %vm138_vm2 = vcmask 64512   ;;  %v343_v9 = vmov 0   ;;  %v188_v34 = vlaneseq  ;;  %s344_s28 = smov [#allocation12]  }
  0x1b   :  { %256 = vmatpush3.xpose.msra.mxu0 %v40_v2  ;;  %v48_v4 = vmul.f32 %v47_v1, %v46_v3  ;;  %51 = vst.msk [vmem:[#allocation3] sm:$0xff] %vm50_vm0, %v342_v5  ;;  %273 = vset.pattern.permute.xlu0 %v343_v9  ;;  %vm195_vm4 = vcmask 57344  }
  0x1c   :  { %v189_v36 = vand.u32 127, %v188_v34 }
  0x1d   :  { %v55_v39 = vmul.f32 %v48_v4, %v40_v2 }
  0x1e   :  { %258 = vmatmul.mubr.f32.vlgmr.msra.gmra.mxu0 %v48_v4  ;;  %vm193_vm3 = vcmp.lt.s32.totalorder %v189_v36, 8 }
  0x21   :  { %v147_v45 = vld [vmem:[#allocation4] sm:$0xff] }
  0x22   :  { %v142_v10 = vld [vmem:[#allocation3] sm:$0xff] }
  0xde   :  { %v134_v6 = vpop.f32.mrf.mxu0 }
  0xdf   :  { %v139_v7 = vsel %vm138_vm2, %v134_v6, -inf }
  0xe0   :  { %140 = vmax.xlane.f32.xlu0 %v139_v7  ;;  %v259_v8 = vpop.f32.mrf.mxu0  ;;  %v169_v14 = vrot.slane %v139_v7, 4 }
  0xe2   :  { %v170_v15 = vmax.f32 %v139_v7, %v169_v14 }
  0xe4   :  { %v171_v16 = vrot.slane %v170_v15, 2 }
  0xe6   :  { %v172_v17 = vmax.f32 %v170_v15, %v171_v16 }
  0xe8   :  { %v173_v18 = vrot.slane %v172_v17, 1 }
  0xea   :  { %v174_v19 = vmax.f32 %v172_v17, %v173_v18 }
  0xec   :  { %v175_v20 = vsub.f32 %v134_v6, %v174_v19 }
  0xee   :  { %v176_v21 = vmul.f32 1.442695, %v175_v20 }
  0xf0   :  { %274 = vpow2.f32 %v176_v21 }
  0xfd   :  { %v275_v22 = vpop.eup %274 }
  0xfe   :  { %v178_v23 = vsel %vm138_vm2, %v275_v22, 0.0 }
  0xff   :  { %v179_v24 = vrot.slane %v178_v23, 4 }
 0x101   :  { %v180_v25 = vadd.f32 %v179_v24, %v178_v23 }
 0x103   :  { %v181_v26 = vrot.slane %v180_v25, 2 }
 0x105   :  { %v182_v27 = vadd.f32 %v181_v26, %v180_v25 }
 0x107   :  { %v183_v28 = vrot.slane %v182_v27, 1 }
 0x109   :  { %v184_v29 = vadd.f32 %v183_v28, %v182_v27 }
 0x10b   :  { %276 = vlog2.f32 %v184_v29 }
 0x118   :  { %v277_v33 = vpop.eup %276 }
 0x119   :  { %v186_v35 = vmul.f32 0.6931472, %v277_v33 }
 0x11b   :  { %v187_v40 = vadd.f32 %v186_v35, %v174_v19 }
 0x11d   :  { %v194_v41 = vsel %vm193_vm3, %v187_v40, 0.0 }
 0x11e   :  { %v196_v42 = vsel %vm195_vm4, %v194_v41, 0.0 }
 0x169   :  { %v141_v11 = vpop.xlane.xlu0 %140 }
 0x16a   :  { %v143_v12 = vmax.f32 %v142_v10, %v141_v11 }
 0x16c   :  { %v144_v13 = vsub.f32 %v142_v10, %v143_v12  ;;  %163 = vst.msk [vmem:[#allocation3] sm:$0xff] %vm50_vm0, %v143_v12  ;;  %151 = vperm.xlu0 %273, %v143_v12  }
 0x16e   :  { %v145_v43 = vmul.f32 1.442695, %v144_v13 }
 0x173   :  { %v212_v2 = vld [vmem:[#allocation3] sm:$0xff] }
 0x1e7   :  { %v152_v30 = vpop.permute.xlu0 %151 }
 0x1e8   :  { %v154_v31 = vsub.f32 %v134_v6, %v152_v30 }
 0x1ea   :  { %v155_v32 = vmul.f32 1.442695, %v154_v31 }
 0x1ec   :  { %278 = vpow2.f32 %v155_v32 }
 0x1ed   :  { %280 = vpow2.f32 %v145_v43 }
 0x1f9   :  { %v279_v37 = vpop.eup %278 }
 0x1fa   :  { %v157_v38 = vsel %vm138_vm2, %v279_v37, 0.0  ;;  %v281_v44 = vpop.eup %280 }
 0x1fb   :  { %158 = vadd.xlane.f32.xlu1 %v157_v38  ;;  %v148_v46 = vmul.f32 %v281_v44, %v147_v45 }
 0x1ff   :  { %56 = vadd.xlane.f32.xlu1 %v55_v39 }
 0x203   :  { %197 = vadd.xlane.f32.xlu1 %v196_v42 }
 0x284   :  { %v159_v47 = vpop.xlane.xlu1 %158 }
 0x285   :  { %v160_v48 = vadd.f32 %v159_v47, %v148_v46 }
 0x287   :  { %162 = vst.msk [vmem:[#allocation4] sm:$0xff] %vm50_vm0, %v160_v48 }
 0x288   :  { %v57_v49 = vpop.xlane.xlu1 %56 }
 0x289   :  { %v58_v50 = vrot.slane %v57_v49, 4 }
 0x28b   :  { %v59_v51 = vadd.f32 %v58_v50, %v57_v49 }
 0x28c   :  { %v198_v52 = vpop.xlane.xlu1 %197 }
 0x28d   :  { %v60_v53 = vrot.slane %v59_v51, 2  ;;  %v199_v54 = vrot.slane %v198_v52, 4 }
 0x28e   :  { %v213_v55 = vld [vmem:[#allocation4] sm:$0xff] }
 0x28f   :  { %v200_v56 = vadd.f32 %v199_v54, %v198_v52  ;;  %v61_v57 = vadd.f32 %v60_v53, %v59_v51  ;;  %282 = vlog2.f32 %v213_v55 }
 0x291   :  { %v201_v58 = vrot.slane %v200_v56, 2  ;;  %v62_v59 = vrot.slane %v61_v57, 1 }
 0x293   :  { %v63_v60 = vadd.f32 %v62_v59, %v61_v57  ;;  %v202_v61 = vadd.f32 %v201_v58, %v200_v56 }
 0x295   :  { %260 = vpush %v63_v60  ;;  %v203_v62 = vrot.slane %v202_v61, 1 }
 0x297   :  { %v204_v63 = vadd.f32 %v203_v62, %v202_v61 }
 0x299   :  { %262 = vpush %v204_v63 }
 0x29c   :  { %v283_v0 = vpop.eup %282 }
 0x29d   :  { %v215_v1 = vmul.f32 0.6931472, %v283_v0 }
 0x29f   :  { %v216_v3 = vadd.f32 %v215_v1, %v212_v2 }
 0x2a1   :  { %v217_v4 = vsel %vm50_vm0, %v216_v3, 0.0 }
 0x2a2   :  { %218 = vadd.xlane.f32.xlu1 %v217_v4 }
 0x2c6   :  { %s261_s1 = spop %260 }
 0x2c7   :  { %s230_s24 = smul.f32 2.0, %s261_s1 }
 0x2ca   :  { %s263_s2 = spop %262 }
 0x32b   :  { %v219_v5 = vpop.xlane.xlu1 %218 }
 0x32c   :  { %v220_v6 = vrot.slane %v219_v5, 4 }
 0x32e   :  { %v221_v7 = vadd.f32 %v220_v6, %v219_v5 }
 0x330   :  { %v222_v8 = vrot.slane %v221_v7, 2 }
 0x332   :  { %v223_v9 = vadd.f32 %v222_v8, %v221_v7 }
 0x334   :  { %v224_v10 = vrot.slane %v223_v9, 1 }
 0x336   :  { %v225_v11 = vadd.f32 %v224_v10, %v223_v9 }
 0x338   :  { %264 = vpush %v225_v11 }
 0x369   :  { %s265_s23 = spop %264 }
 0x36a   :  { %s228_s25 = sadd.f32 %s265_s23, %s263_s2 }
 0x36c   :  { %s231_s26 = ssub.f32 %s228_s25, %s230_s24 }
 0x36e   :  { %s234_s27 = smul.f32 0.0625, %s231_s26 }
 0x370   :  { %236 = sst [smem:[#allocation12]] %s234_s27 }
 0x371   :  { %244 = dma.smem_to_hbm %s344_s28, 16, %s388_s3, [#allocation9]  }
 0x372   :  { %336 = dma.done.wait [#allocation9], 16  }
 0x373   :  { %337 = vsyncadd [#allocation9], 4294967280 }
 0x374   :  { %248 = sfence }
 0x375   :  { %249 = vsyncpa [#allocation8], 1 }
 0x376   :  { %250 = vsyncpa [#allocation11], 1 }
 0x377   :  { %251 = vsyncpa [#allocation9], 1 }

</bundles_post_ra>
